<compile_context>
chip_gen: v7x
topology: tpu7x:2x2x1
jax: 0.10.0
libtpu: 0.0.40
codegen_flags: <defaults>
</compile_context>

<pallas_src>
import functools

import jax
import jax.numpy as jnp
import numpy as np
from jax.experimental import pallas as pl
from jax.experimental.pallas import tpu as pltpu

SUBLANE = 8


def _round_up(n, m):
    return ((n + m - 1) // m) * m


def _cdiv(a, b):
    return (a + b - 1) // b


def _device_kind():
    try:
        return jax.devices()[0].device_kind.lower()
    except Exception:
        return ""


def _default_tanh_dtype(kind=None):
    kind = _device_kind() if kind is None else kind
    # bf16 EUP path only on v6e / v7x; v5e (and unknown) has no bf16 VPU/EUP.
    if "v6" in kind or "v7" in kind or "7x" in kind:
        return jnp.bfloat16
    return jnp.float32


# ----------------------------------------------------------------------------
# Pallas kernel: full fused forward on one batch tile
# ----------------------------------------------------------------------------
def _ppo_fused_kernel(s_rows, h_rows, out_w, act_dtype, x_ref, p_ref, out_ref):
    # Parameter slab layout (rows; lane width W = hidden lanes):
    #   [0            , s_rows)            : w1     [s_rows, W]
    #   [s_rows       , s_rows +   h_rows) : w2     [h_rows, W]
    #   [s_rows+h_rows, s_rows + 2*h_rows) : w_head [h_rows, W]  (mean lanes 0..A-1,
    #                                                              value lane A)
    #   row s_rows+2*h_rows + 0            : b1     [1, W]
    #   row s_rows+2*h_rows + 8            : b2     [1, W]
    #   row s_rows+2*h_rows + 16           : b_head [1, W]
    r_w2 = s_rows
    r_wh = s_rows + h_rows
    r_b = s_rows + 2 * h_rows

    x = x_ref[...]                                            # [Bt, s_rows] f32

    pre1 = (jnp.dot(x, p_ref[0:r_w2, :], preferred_element_type=jnp.float32)
            + p_ref[r_b:r_b + 1, :])
    h1 = jnp.tanh(pre1.astype(act_dtype)).astype(jnp.float32)  # [Bt, W]

    pre2 = (jnp.dot(h1, p_ref[r_w2:r_wh, :], preferred_element_type=jnp.float32)
            + p_ref[r_b + 8:r_b + 9, :])
    h2 = jnp.tanh(pre2.astype(act_dtype)).astype(jnp.float32)  # [Bt, W]

    # Fused mean+value head; only the first out_w lanes carry data.
    head = (jnp.dot(h2, p_ref[r_wh:r_b, :], preferred_element_type=jnp.float32)
            + p_ref[r_b + 16:r_b + 17, :])                     # [Bt, W]
    out_ref[...] = head[:, 0:out_w]                            # narrow (out_w-wide) store


# ----------------------------------------------------------------------------
# Parameter packing: one f32 slab of width = hidden lanes (single DMA)
# ----------------------------------------------------------------------------
def pack_params(params, state_dim, hidden_dim, action_dim):
    assert action_dim + 1 <= hidden_dim
    S8 = _round_up(state_dim, SUBLANE)
    H8 = _round_up(hidden_dim, SUBLANE)
    W = H8
    out_w = _round_up(action_dim + 1, SUBLANE)

    w1 = jnp.zeros((S8, W), jnp.float32).at[:state_dim, :hidden_dim].set(params["w1"])
    w2 = jnp.zeros((H8, W), jnp.float32).at[:hidden_dim, :hidden_dim].set(params["w2"])
    wh = jnp.zeros((H8, W), jnp.float32)
    wh = wh.at[:hidden_dim, :action_dim].set(params["wm"])
    wh = wh.at[:hidden_dim, action_dim:action_dim + 1].set(params["wv"])

    # Biases, each at an 8-row-aligned offset (rows in between are zero).
    bias = jnp.zeros((24, W), jnp.float32)
    bias = bias.at[0:1, :hidden_dim].set(params["b1"])
    bias = bias.at[8:9, :hidden_dim].set(params["b2"])
    bias = bias.at[16:17, :action_dim].set(params["bm"])
    bias = bias.at[16:17, action_dim:action_dim + 1].set(params["bv"])

    slab = jnp.concatenate([w1, w2, wh, bias], axis=0)  # [S8 + 2*H8 + 24, W]
    return slab, (S8, H8, out_w)


# ----------------------------------------------------------------------------
# Wrapper: batch-tiled pallas_call; mean/value/std recovered under the same jit
# ----------------------------------------------------------------------------
def ppo_forward(x, param_slab, dims, action_dim, *, block_b=None, tanh_dtype=None):
    S8, H8, out_w = dims
    B, S = x.shape

    kind = _device_kind()
    if block_b is None:
        block_b = 4096 if ("v7" in kind or "7x" in kind) else 2048
    if tanh_dtype is None:
        tanh_dtype = _default_tanh_dtype(kind)

    # Pad batch only to a multiple of 8 and features only to S8 (usually a
    # no-op); no 128-lane HBM padding and no rounding of B up to the tile.
    B8 = _round_up(B, SUBLANE)
    if (B8, S8) != (B, S) or x.dtype != jnp.float32:
        x_in = jnp.zeros((B8, S8), jnp.float32).at[:B, :S].set(x)
    else:
        x_in = x

    # Big batch tile to amortize per-grid-step overhead; ensure >=2 balanced
    # grid steps when the batch allows it (v7x megacore under "parallel").
    Bt = min(block_b, B8)
    if B8 <= block_b and B8 >= 2 * SUBLANE:
        Bt = _round_up(_cdiv(B8, 2), SUBLANE)
    n_blocks = _cdiv(B8, Bt)

    slab_rows, W = param_slab.shape
    kernel = functools.partial(_ppo_fused_kernel, S8, H8, out_w, tanh_dtype)

    out = pl.pallas_call(
        kernel,
        out_shape=jax.ShapeDtypeStruct((B8, out_w), jnp.float32),
        grid_spec=pltpu.PrefetchScalarGridSpec(
            num_scalar_prefetch=0,
            grid=(n_blocks,),
            in_specs=[
                pl.BlockSpec((Bt, S8), lambda i: (i, 0)),         # x tile (narrow)
                pl.BlockSpec((slab_rows, W), lambda i: (0, 0)),   # params resident
            ],
            out_specs=pl.BlockSpec((Bt, out_w), lambda i: (i, 0)),
        ),
        compiler_params=pltpu.CompilerParams(
            dimension_semantics=("parallel",),
        ),
    )(x_in, param_slab)

    mean = out[:B, :action_dim]
    value = out[:B, action_dim:action_dim + 1]
    # The module's forward() ignores self.policy_log_std and uses a constant
    # log-std of 0.5, so std is the compile-time constant exp(0.5).
    std = jnp.full((B, action_dim), float(np.exp(0.5)), jnp.float32)
    return mean, std, value


# ----------------------------------------------------------------------------
# Deterministic parameter init (mirrors nn.init.orthogonal_(gain=1000), zero bias)
# ----------------------------------------------------------------------------
def _orthogonal(key, out_features, in_features, gain):
    """PyTorch-style orthogonal init for a (out, in) weight, returned as (in, out)."""
    rows, cols = out_features, in_features
    flat = jax.random.normal(key, (max(rows, cols), min(rows, cols)), dtype=jnp.float32)
    q, r = jnp.linalg.qr(flat)
    d = jnp.sign(jnp.diag(r))
    q = q * d[None, :]
    if rows < cols:
        q = q.T
    w_torch = gain * q[:rows, :cols]            # (out, in), like torch Linear.weight
    return jnp.asarray(w_torch.T, jnp.float32)  # stored as (in, out) for x @ W


def init_params(key, state_dim, action_dim, hidden_dim=64, gain=1000.0):
    k1, k2, k3, k4 = jax.random.split(key, 4)
    return {
        "w1": _orthogonal(k1, hidden_dim, state_dim, gain),
        "b1": jnp.zeros((1, hidden_dim), jnp.float32),
        "w2": _orthogonal(k2, hidden_dim, hidden_dim, gain),
        "b2": jnp.zeros((1, hidden_dim), jnp.float32),
        "wm": _orthogonal(k3, action_dim, hidden_dim, gain),
        "bm": jnp.zeros((1, action_dim), jnp.float32),
        "wv": _orthogonal(k4, 1, hidden_dim, gain),
        "bv": jnp.zeros((1, 1), jnp.float32),
    }


# ----------------------------------------------------------------------------
# Pure-JAX reference for correctness check
# ----------------------------------------------------------------------------
def ppo_forward_ref(x, p):
    h1 = jnp.tanh(x @ p["w1"] + p["b1"])
    h2 = jnp.tanh(h1 @ p["w2"] + p["b2"])
    mean = h2 @ p["wm"] + p["bm"]
    std = jnp.full_like(mean, jnp.exp(jnp.float32(0.5)))
    value = h2 @ p["wv"] + p["bv"]
    return mean, std, value


if __name__ == "__main__":
    # Small shapes consistent with the module.
    B, STATE_DIM, ACTION_DIM, HIDDEN_DIM = 8, 16, 4, 64

    key = jax.random.PRNGKey(0)
    k_x, k_p = jax.random.split(key)

    x = jax.random.normal(k_x, (B, STATE_DIM), dtype=jnp.float32)
    params = init_params(k_p, STATE_DIM, ACTION_DIM, HIDDEN_DIM)

    param_slab, dims = pack_params(params, STATE_DIM, HIDDEN_DIM, ACTION_DIM)
    tanh_dtype = _default_tanh_dtype()

    # Single jit so the (usually no-op) pad and the mean/value slices fuse with
    # the pallas_call instead of being separate HBM passes.
    fwd = jax.jit(functools.partial(ppo_forward, dims=dims, action_dim=ACTION_DIM,
                                    tanh_dtype=tanh_dtype))
    mean, std, value = fwd(x, param_slab)
    jax.block_until_ready((mean, std, value))

    # Verify against the pure-JAX reference.  Head outputs are O(1e3) with the
    # gain=1000 init, so tolerances are effectively relative.
    mean_r, std_r, value_r = ppo_forward_ref(x, params)
    if tanh_dtype == jnp.bfloat16:
        rtol, atol = 1e-2, 2.0    # bf16-tanh path (v6e/v7x)
    else:
        rtol, atol = 1e-4, 1e-1   # f32 path (v5e / unknown)
    np.testing.assert_allclose(np.asarray(mean), np.asarray(mean_r), rtol=rtol, atol=atol)
    np.testing.assert_allclose(np.asarray(std), np.asarray(std_r), rtol=1e-6, atol=1e-6)
    np.testing.assert_allclose(np.asarray(value), np.asarray(value_r), rtol=rtol, atol=atol)

    assert mean.shape == (B, ACTION_DIM)
    assert std.shape == (B, ACTION_DIM)
    assert value.shape == (B, 1)

    print("KERNEL_OK")
</pallas_src>

<mosaic_0001>
module attributes {stable_mosaic.version = 11 : i64} {
  func.func @_ppo_fused_kernel(%arg0: i32, %arg1: memref<8x16xf32, #tpu.memory_space<vmem>>, %arg2: memref<168x64xf32, #tpu.memory_space<vmem>>, %arg3: memref<8x8xf32, #tpu.memory_space<vmem>>) attributes {dimension_semantics = [#tpu.dimension_semantics<parallel>], iteration_bounds = array<i64: 1>, scalar_prefetch = 0 : i64, scratch_operands = 0 : i64, tpu.core_type = #tpu.core_type<tc>, window_params = [{transform_indices = @transform_0, window_bounds = array<i64: 8, 16>}, {pipeline_mode = #tpu.pipeline_mode<synchronous>, transform_indices = @transform_1, window_bounds = array<i64: 168, 64>}, {transform_indices = @transform_2, window_bounds = array<i64: 8, 8>}]} {
    %c0 = arith.constant 0 : index
    %c0_0 = arith.constant 0 : index
    %0 = vector.load %arg1[%c0, %c0_0] : memref<8x16xf32, #tpu.memory_space<vmem>>, vector<8x16xf32>
    %c0_1 = arith.constant 0 : index
    %c0_2 = arith.constant 0 : index
    %1 = vector.load %arg2[%c0_1, %c0_2] : memref<168x64xf32, #tpu.memory_space<vmem>>, vector<16x64xf32>
    %cst = arith.constant dense<0.000000e+00> : vector<8x64xf32>
    %2 = tpu.matmul %0, %1, %cst {dimension_numbers = #tpu.dot_dimension_numbers<[1], [0], [0], [1], [0, 0, 1, 1], [], []>} : vector<8x16xf32>, vector<16x64xf32>, vector<8x64xf32> -> vector<8x64xf32>
    %c144 = arith.constant 144 : index
    %c0_3 = arith.constant 0 : index
    %3 = vector.load %arg2[%c144, %c0_3] : memref<168x64xf32, #tpu.memory_space<vmem>>, vector<1x64xf32>
    %4 = vector.broadcast %3 : vector<1x64xf32> to vector<8x64xf32>
    %5 = arith.addf %2, %4 : vector<8x64xf32>
    %6 = math.tanh %5 : vector<8x64xf32>
    %c16 = arith.constant 16 : index
    %c0_4 = arith.constant 0 : index
    %7 = vector.load %arg2[%c16, %c0_4] : memref<168x64xf32, #tpu.memory_space<vmem>>, vector<64x64xf32>
    %cst_5 = arith.constant dense<0.000000e+00> : vector<8x64xf32>
    %8 = tpu.matmul %6, %7, %cst_5 {dimension_numbers = #tpu.dot_dimension_numbers<[1], [0], [0], [1], [0, 0, 1, 1], [], []>} : vector<8x64xf32>, vector<64x64xf32>, vector<8x64xf32> -> vector<8x64xf32>
    %c152 = arith.constant 152 : index
    %c0_6 = arith.constant 0 : index
    %9 = vector.load %arg2[%c152, %c0_6] : memref<168x64xf32, #tpu.memory_space<vmem>>, vector<1x64xf32>
    %10 = vector.broadcast %9 : vector<1x64xf32> to vector<8x64xf32>
    %11 = arith.addf %8, %10 : vector<8x64xf32>
    %12 = math.tanh %11 : vector<8x64xf32>
    %c80 = arith.constant 80 : index
    %c0_7 = arith.constant 0 : index
    %13 = vector.load %arg2[%c80, %c0_7] : memref<168x64xf32, #tpu.memory_space<vmem>>, vector<64x64xf32>
    %cst_8 = arith.constant dense<0.000000e+00> : vector<8x64xf32>
    %14 = tpu.matmul %12, %13, %cst_8 {dimension_numbers = #tpu.dot_dimension_numbers<[1], [0], [0], [1], [0, 0, 1, 1], [], []>} : vector<8x64xf32>, vector<64x64xf32>, vector<8x64xf32> -> vector<8x64xf32>
    %c160 = arith.constant 160 : index
    %c0_9 = arith.constant 0 : index
    %15 = vector.load %arg2[%c160, %c0_9] : memref<168x64xf32, #tpu.memory_space<vmem>>, vector<1x64xf32>
    %16 = vector.broadcast %15 : vector<1x64xf32> to vector<8x64xf32>
    %17 = arith.addf %14, %16 : vector<8x64xf32>
    %18 = vector.extract_strided_slice %17 {offsets = [0, 0], sizes = [8, 8], strides = [1, 1]} : vector<8x64xf32> to vector<8x8xf32>
    %c0_10 = arith.constant 0 : index
    %c0_11 = arith.constant 0 : index
    %19 = vector.load %arg3[%c0_10, %c0_11] : memref<8x8xf32, #tpu.memory_space<vmem>>, vector<8x8xf32>
    tpu.vector_store %arg3[%c0_10, %c0_11], %18 {strides = array<i32>} : memref<8x8xf32, #tpu.memory_space<vmem>>, vector<8x8xf32>,
    return
  }
  func.func @transform_0(%arg0: i32) -> (i32, i32) {
    %c0_i32 = arith.constant 0 : i32
    %c0_i32_0 = arith.constant 0 : i32
    return %arg0, %c0_i32 : i32, i32
  }
  func.func @transform_1(%arg0: i32) -> (i32, i32) {
    %c0_i32 = arith.constant 0 : i32
    %c0_i32_0 = arith.constant 0 : i32
    %c0_i32_1 = arith.constant 0 : i32
    return %c0_i32, %c0_i32_0 : i32, i32
  }
  func.func @transform_2(%arg0: i32) -> (i32, i32) {
    %c0_i32 = arith.constant 0 : i32
    %c0_i32_0 = arith.constant 0 : i32
    return %arg0, %c0_i32 : i32, i32
  }
}

</mosaic_0001>

<bundles_post_ra>
// kernel: ppo_forward.1
= control target key start
LH: loop header
LB: loop body
LE: loop exit
PB: predicated region body
PF: predicated region fallthrough
CT: control target
= control target key end

     0   :  { %v380_v0 = vmov 0.0|0.0   ;;  %vm381_vm0 = vmmov 0   ;;  %v382_v3 = vmov 0.0   ;;  %vm19_vm1 = vcmask 130048   ;;  %s472_s1 = inlined_call_operand.vmem [shape: f32[168,64], index: 1, kind: input, shape index: {}]   ;;  %s473_s0 = inlined_call_operand.vmem [shape: f32[8,16], index: 0, kind: input, shape index: {}]   ;;  %s474_s2 = inlined_call_operand.vmem [shape: f32[8,8], index: 2, kind: output, shape index: {}]  }
   0x1   :  { %346 = vmatprep.subr.bf16.mxu0 %v380_v0  ;;  %v12_v1 = vld [vmem:[%s472_s1] sm:$0xff]  ;;  %v13_v2 = vld [vmem:[%s472_s1 + $0x8] sm:$0xff]  ;;  %305 = vmatprep.mubr.msk.f32.mxu0 %vm381_vm0, %v382_v3  ;;  %v94_v5 = vld [vmem:[%s472_s1 + $0x10] sm:$0xff]  ;;  %vm107_vm2 = vcmask 523264   ;;  %vm268_vm3 = vcmask 64512  }
   0x2   :  { %v347_v4 = vpack.c.bf16 %v13_v2, %v12_v1  ;;  %349 = vmatprep.subr.bf16.mxu1 %v380_v0  ;;  %v95_v6 = vld [vmem:[%s472_s1 + $0x18] sm:$0xff]  ;;  %324 = vmatprep.mubr.msk.f32.mxu1 %vm381_vm0, %v382_v3  ;;  %v11_v8 = vld [vmem:[%s473_s0] sm:$0xff]  ;;  %v97_v10 = vld [vmem:[%s472_s1 + $0x28] sm:$0xff] }
   0x3   :  { %v350_v7 = vpack.c.bf16 %v95_v6, %v94_v5  ;;  %v96_v9 = vld [vmem:[%s472_s1 + $0x20] sm:$0xff]  ;;  %v98_v12 = vld [vmem:[%s472_s1 + $0x30] sm:$0xff]  ;;  %v99_v13 = vld [vmem:[%s472_s1 + $0x38] sm:$0xff] }
   0x4   :  { %348 = vmatpush3.bf16.msra.mxu0 %v347_v4  ;;  %v353_v11 = vpack.c.bf16 %v97_v10, %v96_v9  ;;  %v356_v14 = vpack.c.bf16 %v99_v13, %v98_v12  ;;  %v100_v15 = vld [vmem:[%s472_s1 + $0x40] sm:$0xff]  ;;  %v101_v16 = vld [vmem:[%s472_s1 + $0x48] sm:$0xff]  ;;  %v182_v18 = vld [vmem:[%s472_s1 + $0x50] sm:$0xff] }
   0x5   :  { %351 = vmatpush3.bf16.msra.mxu1 %v350_v7  ;;  %361 = vmatprep.subr.bf16.mxu0 %v380_v0  ;;  %v359_v17 = vpack.c.bf16 %v101_v16, %v100_v15  ;;  %v183_v19 = vld [vmem:[%s472_s1 + $0x58] sm:$0xff]  ;;  %v274_v21 = vld [vmem:[%s472_s1 + $0x90] ss:$0 sm:$0xff]  ;;  %v184_v26 = vld [vmem:[%s472_s1 + $0x60] sm:$0xff] }
   0x6   :  { %352 = vmatprep.subr.bf16.mxu1 %v380_v0  ;;  %v362_v20 = vpack.c.bf16 %v183_v19, %v182_v18  ;;  %v185_v27 = vld [vmem:[%s472_s1 + $0x68] sm:$0xff]  ;;  %v186_v29 = vld [vmem:[%s472_s1 + $0x70] sm:$0xff]  ;;  %v187_v30 = vld [vmem:[%s472_s1 + $0x78] sm:$0xff] }
   0x7   :  { %306 = vmatmul.mubr.msk.f32.vlgmr.msra.gmra.mrb[0].mxu0 %vm19_vm1, %v11_v8  ;;  %v365_v28 = vpack.c.bf16 %v185_v27, %v184_v26  ;;  %v368_v31 = vpack.c.bf16 %v187_v30, %v186_v29  ;;  %v188_v32 = vld [vmem:[%s472_s1 + $0x80] sm:$0xff]  ;;  %v189_v33 = vld [vmem:[%s472_s1 + $0x88] sm:$0xff]  ;;  %v276_v35 = vld [vmem:[%s472_s1 + $0x98] ss:$0 sm:$0xff] }
   0x8   :  { %343 = vmatprep.mubr.msk.f32.mxu0 %vm381_vm0, %v382_v3  ;;  %363 = vmatpush3.bf16.msra.mxu0 %v362_v20  ;;  %v371_v34 = vpack.c.bf16 %v189_v33, %v188_v32  ;;  %v278_v40 = vld [vmem:[%s472_s1 + $0xa0] ss:$0 sm:$0xff] }
   0x9   :  { %354 = vmatpush3.bf16.msra.mxu1 %v353_v11  ;;  %364 = vmatprep.subr.bf16.mxu0 %v380_v0 }
   0xa   :  { %355 = vmatprep.subr.bf16.mxu1 %v380_v0 }
   0xc   :  { %366 = vmatpush3.bf16.msra.mxu0 %v365_v28 }
   0xd   :  { %357 = vmatpush3.bf16.msra.mxu1 %v356_v14  ;;  %367 = vmatprep.subr.bf16.mxu0 %v380_v0 }
   0xe   :  { %358 = vmatprep.subr.bf16.mxu1 %v380_v0 }
  0x10   :  { %369 = vmatpush3.bf16.msra.mxu0 %v368_v31 }
  0x11   :  { %360 = vmatpush3.bf16.msra.mxu1 %v359_v17  ;;  %370 = vmatprep.subr.bf16.mxu0 %v380_v0 }
  0x14   :  { %372 = vmatpush3.bf16.msra.mxu0 %v371_v34 }
  0xda   :  { %v89_v22 = vpop.f32.mrb[0].mxu0 }
  0xdb   :  { %v90_v23 = vadd.f32 %v274_v21, %v89_v22  ;;  %v307_v24 = vpop.f32.mrb[1].mxu0 }
  0xdd   :  { %376 = vtanh.f32 %v90_v23 }
  0xe7   :  { %v377_v25 = vpop.eup %376 }
  0xe8   :  { %325 = vmatmul.mubr.msk.f32.vlgmr.msra.gmra.mrb[0].mxu1 %vm107_vm2, %v377_v25 }
 0x1bb   :  { %v177_v36 = vpop.f32.mrb[0].mxu1 }
 0x1bc   :  { %v178_v37 = vadd.f32 %v276_v35, %v177_v36  ;;  %v326_v38 = vpop.f32.mrb[1].mxu1 }
 0x1be   :  { %378 = vtanh.f32 %v178_v37 }
 0x1c8   :  { %v379_v39 = vpop.eup %378 }
 0x1c9   :  { %344 = vmatmul.mubr.msk.f32.vlgmr.msra.gmra.mrb[2].mxu0 %vm107_vm2, %v379_v39 }
 0x29c   :  { %v264_v41 = vpop.f32.mrb[2].mxu0 }
 0x29d   :  { %v265_v42 = vadd.f32 %v278_v40, %v264_v41  ;;  %v345_v43 = vpop.f32.mrb[3].mxu0 }
 0x29f   :  { %269 = vst.msk [vmem:[%s474_s2] sm:$0xff] %vm268_vm3, %v265_v42 }

</bundles_post_ra>
